<compile_context>
chip_gen: v7x
topology: tpu7x:2x2x1
jax: 0.10.0
libtpu: 0.0.40
codegen_flags: <defaults>
</compile_context>

<pallas_src>
import functools
import math

import jax
import jax.numpy as jnp
from jax.experimental import pallas as pl
from jax.experimental.pallas import tpu as pltpu

_INV_SQRT2 = 1.0 / math.sqrt(2.0)
_TANH_C = math.sqrt(2.0 / math.pi)


def _adapter_kernel(x_ref, w1_ref, b1_ref, w2_ref, b2_ref, o_ref, *,
                    approximate):
    # Native-dtype MXU feed (bf16 at full rate if the caller passes bf16).
    x = x_ref[...]

    # linear1: (tm, D) @ (D, H) -> f32 accumulator, + bias in f32.
    h = jnp.dot(x, w1_ref[...], preferred_element_type=jnp.float32)
    h = h + b1_ref[...].astype(jnp.float32)

    if approximate:
        # tanh GELU: transcendental goes to the EUP (otherwise-idle slot).
        h = 0.5 * h * (1.0 + jnp.tanh(_TANH_C * (h + 0.044715 * h * h * h)))
    else:
        # Exact GELU (matches nn.GELU(approximate='none')), computed in f32.
        h = 0.5 * h * (1.0 + jax.lax.erf(h * _INV_SQRT2))

    # linear2: feed the MXU in the weight's native dtype, accumulate in f32.
    z = jnp.dot(h.astype(w2_ref.dtype), w2_ref[...],
                preferred_element_type=jnp.float32)
    z = z + b2_ref[...].astype(jnp.float32)

    # Residual in f32, single cast to the output dtype.
    o_ref[...] = (x.astype(jnp.float32) + z).astype(o_ref.dtype)


def _round_up(x, m):
    return (x + m - 1) // m * m


def adapter_forward(x, w1, b1, w2, b2, *, approximate_gelu=False):
    """x: (..., in_dim); w1: (in_dim, hidden); b1: (hidden,);
    w2: (hidden, out_dim); b2: (out_dim,).  Requires in_dim == out_dim."""
    orig_shape = x.shape
    in_dim = orig_shape[-1]
    hidden = w1.shape[1]
    out_dim = w2.shape[1]
    assert w1.shape[0] == in_dim and w2.shape[0] == hidden
    assert in_dim == out_dim, "residual connection requires in_dim == out_dim"

    x2 = x.reshape(-1, in_dim)          # free for contiguous x (view reshape)
    N = x2.shape[0]

    x_itemsize = jnp.dtype(x.dtype).itemsize
    w1_itemsize = jnp.dtype(w1.dtype).itemsize
    w2_itemsize = jnp.dtype(w2.dtype).itemsize
    sub = 8 if x_itemsize >= 4 else (16 if x_itemsize == 2 else 32)

    # Generation-aware VMEM budget; the SAME number gates tile shrinking and
    # is passed as vmem_limit_bytes (no premature tm halving).
    try:
        vmem_cap = pltpu.get_tpu_info().vmem_capacity_bytes
    except Exception:
        vmem_cap = 64 * 1024 * 1024     # conservative fallback (v7x-sized)
    vmem_budget = int((vmem_cap * 3) // 4)   # ~48 MiB on v7x, ~96 MiB on v5e/v6e

    # VMEM-resident tiles are padded to lane=128 internally; account for that
    # in the footprint, but do NOT pad anything in HBM.
    D_v = _round_up(in_dim, 128)
    H_v = _round_up(hidden, 128)
    O_v = _round_up(out_dim, 128)

    def footprint(t):
        # Deterministic accounting: default (double) buffering everywhere.
        w_bytes = 2 * (D_v * H_v * w1_itemsize + H_v * O_v * w2_itemsize)
        b_bytes = 2 * (H_v + O_v) * 4
        io_bytes = 2 * t * (D_v + O_v) * x_itemsize        # x + out tiles
        tmp_bytes = 4 * t * (H_v + D_v + O_v)              # f32 intermediates
        return w_bytes + b_bytes + io_bytes + tmp_bytes

    # Row tile: target a ~2 MiB x tile (streaming-roofline sweet spot), round
    # to the sublane packing, clamp to the problem size, gate by VMEM budget.
    target_tile_bytes = 2 * 1024 * 1024
    tm_eff = max(sub, min(2048, target_tile_bytes // max(1, D_v * x_itemsize)))
    tm_eff = _round_up(tm_eff, sub)
    tm_eff = min(tm_eff, _round_up(N, sub))
    while tm_eff > sub and footprint(tm_eff) > vmem_budget:
        tm_eff = max(sub, _round_up(tm_eff // 2, sub))
    # TODO(synk): for very large (in_dim x hidden) weights that alone exceed
    # the VMEM budget, add a K-tiled 'arbitrary' grid axis (or bf16 weights)
    # instead of shrinking tm toward sliver tiles.

    # Give the 'parallel' row axis at least 2 steps so v7x can use both TCs.
    if pl.cdiv(N, tm_eff) < 2 and N > sub and tm_eff > sub:
        tm_eff = max(sub, _round_up(tm_eff // 2, sub))

    grid = (pl.cdiv(N, tm_eff),)

    b1_2d = b1.reshape(1, hidden)
    b2_2d = b2.reshape(1, out_dim)

    cost = pl.CostEstimate(
        flops=2 * N * in_dim * hidden + 2 * N * hidden * out_dim,
        transcendentals=N * hidden,
        bytes_accessed=(N * in_dim + N * out_dim) * x_itemsize
        + w1.size * w1_itemsize + w2.size * w2_itemsize
        + (b1.size + b2.size) * jnp.dtype(b1.dtype).itemsize,
    )

    kernel = functools.partial(_adapter_kernel, approximate=approximate_gelu)

    out2 = pl.pallas_call(
        kernel,
        out_shape=jax.ShapeDtypeStruct((N, out_dim), x.dtype),
        grid_spec=pltpu.PrefetchScalarGridSpec(
            num_scalar_prefetch=0,
            grid=grid,
            in_specs=[
                # x tile: last block dim == full array dim -> legal without
                # 128-padding; rows handled by cdiv grid + clamped DMA.
                pl.BlockSpec((tm_eff, in_dim), lambda i: (i, 0)),
                pl.BlockSpec((in_dim, hidden), lambda i: (0, 0)),   # W1 resident
                pl.BlockSpec((1, hidden), lambda i: (0, 0)),        # b1
                pl.BlockSpec((hidden, out_dim), lambda i: (0, 0)),  # W2 resident
                pl.BlockSpec((1, out_dim), lambda i: (0, 0)),       # b2
            ],
            out_specs=pl.BlockSpec((tm_eff, out_dim), lambda i: (i, 0)),
        ),
        compiler_params=pltpu.CompilerParams(
            dimension_semantics=("parallel",),   # rows shard across TCs (v7x)
            vmem_limit_bytes=vmem_budget,
        ),
        cost_estimate=cost,
    )(x2, w1, b1_2d, w2, b2_2d)

    return out2.reshape(orig_shape[:-1] + (out_dim,))


def adapter_ref(x, w1, b1, w2, b2):
    h = x @ w1 + b1
    h = 0.5 * h * (1.0 + jax.lax.erf(h * _INV_SQRT2))
    z = h @ w2 + b2
    return x + z


if __name__ == "__main__":
    # Small shapes consistent with the module: batch=2, seq=8,
    # in_dim = out_dim = 32, hidden = 64.
    batch, seq, in_dim, hidden = 2, 8, 32, 64
    out_dim = in_dim

    key = jax.random.PRNGKey(0)
    kx, kw1, kb1, kw2, kb2 = jax.random.split(key, 5)

    x = jax.random.normal(kx, (batch, seq, in_dim), dtype=jnp.float32)

    # Deterministic nn.Linear-style init (uniform in +-1/sqrt(fan_in)),
    # weights stored pre-transposed as (in, hidden) / (hidden, out).
    lim1 = 1.0 / math.sqrt(in_dim)
    lim2 = 1.0 / math.sqrt(hidden)
    w1 = jax.random.uniform(kw1, (in_dim, hidden), minval=-lim1, maxval=lim1,
                            dtype=jnp.float32)
    b1 = jax.random.uniform(kb1, (hidden,), minval=-lim1, maxval=lim1,
                            dtype=jnp.float32)
    w2 = jax.random.uniform(kw2, (hidden, out_dim), minval=-lim2, maxval=lim2,
                            dtype=jnp.float32)
    b2 = jax.random.uniform(kb2, (out_dim,), minval=-lim2, maxval=lim2,
                            dtype=jnp.float32)

    out = adapter_forward(x, w1, b1, w2, b2)
    out = jax.block_until_ready(out)

    ref = adapter_ref(x, w1, b1, w2, b2)
    assert out.shape == (batch, seq, out_dim)
    assert jnp.allclose(out, ref, atol=2e-5, rtol=2e-5), "mismatch vs reference"

    print("KERNEL_OK")
</pallas_src>

<mosaic_0001>
module attributes {stable_mosaic.version = 11 : i64} {
  func.func @_adapter_kernel(%arg0: i32, %arg1: memref<8x32xf32, #tpu.memory_space<vmem>>, %arg2: memref<32x64xf32, #tpu.memory_space<vmem>>, %arg3: memref<1x64xf32, #tpu.memory_space<vmem>>, %arg4: memref<64x32xf32, #tpu.memory_space<vmem>>, %arg5: memref<1x32xf32, #tpu.memory_space<vmem>>, %arg6: memref<8x32xf32, #tpu.memory_space<vmem>>) attributes {dimension_semantics = [#tpu.dimension_semantics<parallel>], iteration_bounds = array<i64: 2>, scalar_prefetch = 0 : i64, scratch_operands = 0 : i64, tpu.core_type = #tpu.core_type<tc>, window_params = [{transform_indices = @transform_0, window_bounds = array<i64: 8, 32>}, {pipeline_mode = #tpu.pipeline_mode<synchronous>, transform_indices = @transform_1, window_bounds = array<i64: 32, 64>}, {pipeline_mode = #tpu.pipeline_mode<synchronous>, transform_indices = @transform_2, window_bounds = array<i64: 1, 64>}, {pipeline_mode = #tpu.pipeline_mode<synchronous>, transform_indices = @transform_3, window_bounds = array<i64: 64, 32>}, {pipeline_mode = #tpu.pipeline_mode<synchronous>, transform_indices = @transform_4, window_bounds = array<i64: 1, 32>}, {transform_indices = @transform_5, window_bounds = array<i64: 8, 32>}]} {
    %c0 = arith.constant 0 : index
    %c0_0 = arith.constant 0 : index
    %0 = vector.load %arg1[%c0, %c0_0] : memref<8x32xf32, #tpu.memory_space<vmem>>, vector<8x32xf32>
    %c0_1 = arith.constant 0 : index
    %c0_2 = arith.constant 0 : index
    %1 = vector.load %arg2[%c0_1, %c0_2] : memref<32x64xf32, #tpu.memory_space<vmem>>, vector<32x64xf32>
    %cst = arith.constant dense<0.000000e+00> : vector<8x64xf32>
    %2 = tpu.matmul %0, %1, %cst {dimension_numbers = #tpu.dot_dimension_numbers<[1], [0], [0], [1], [0, 0, 1, 1], [], []>} : vector<8x32xf32>, vector<32x64xf32>, vector<8x64xf32> -> vector<8x64xf32>
    %c0_3 = arith.constant 0 : index
    %c0_4 = arith.constant 0 : index
    %3 = vector.load %arg3[%c0_3, %c0_4] : memref<1x64xf32, #tpu.memory_space<vmem>>, vector<1x64xf32>
    %4 = vector.broadcast %3 : vector<1x64xf32> to vector<8x64xf32>
    %5 = arith.addf %2, %4 : vector<8x64xf32>
    %cst_5 = arith.constant 5.000000e-01 : f32
    %6 = vector.broadcast %cst_5 : f32 to vector<8x64xf32>
    %7 = arith.mulf %6, %5 : vector<8x64xf32>
    %cst_6 = arith.constant 0.707106769 : f32
    %8 = vector.broadcast %cst_6 : f32 to vector<8x64xf32>
    %9 = arith.mulf %5, %8 : vector<8x64xf32>
    %10 = math.erf %9 : vector<8x64xf32>
    %cst_7 = arith.constant 1.000000e+00 : f32
    %11 = vector.broadcast %cst_7 : f32 to vector<8x64xf32>
    %12 = arith.addf %11, %10 : vector<8x64xf32>
    %13 = arith.mulf %7, %12 : vector<8x64xf32>
    %c0_8 = arith.constant 0 : index
    %c0_9 = arith.constant 0 : index
    %14 = vector.load %arg4[%c0_8, %c0_9] : memref<64x32xf32, #tpu.memory_space<vmem>>, vector<64x32xf32>
    %cst_10 = arith.constant dense<0.000000e+00> : vector<8x32xf32>
    %15 = tpu.matmul %13, %14, %cst_10 {dimension_numbers = #tpu.dot_dimension_numbers<[1], [0], [0], [1], [0, 0, 1, 1], [], []>} : vector<8x64xf32>, vector<64x32xf32>, vector<8x32xf32> -> vector<8x32xf32>
    %c0_11 = arith.constant 0 : index
    %c0_12 = arith.constant 0 : index
    %16 = vector.load %arg5[%c0_11, %c0_12] : memref<1x32xf32, #tpu.memory_space<vmem>>, vector<1x32xf32>
    %17 = vector.broadcast %16 : vector<1x32xf32> to vector<8x32xf32>
    %18 = arith.addf %15, %17 : vector<8x32xf32>
    %19 = arith.addf %0, %18 : vector<8x32xf32>
    %c0_13 = arith.constant 0 : index
    %c0_14 = arith.constant 0 : index
    %20 = vector.load %arg6[%c0_13, %c0_14] : memref<8x32xf32, #tpu.memory_space<vmem>>, vector<8x32xf32>
    tpu.vector_store %arg6[%c0_13, %c0_14], %19 {strides = array<i32>} : memref<8x32xf32, #tpu.memory_space<vmem>>, vector<8x32xf32>,
    return
  }
  func.func @transform_0(%arg0: i32) -> (i32, i32) {
    %c0_i32 = arith.constant 0 : i32
    %c0_i32_0 = arith.constant 0 : i32
    return %arg0, %c0_i32 : i32, i32
  }
  func.func @transform_1(%arg0: i32) -> (i32, i32) {
    %c0_i32 = arith.constant 0 : i32
    %c0_i32_0 = arith.constant 0 : i32
    %c0_i32_1 = arith.constant 0 : i32
    return %c0_i32, %c0_i32_0 : i32, i32
  }
  func.func @transform_2(%arg0: i32) -> (i32, i32) {
    %c0_i32 = arith.constant 0 : i32
    %c0_i32_0 = arith.constant 0 : i32
    %c0_i32_1 = arith.constant 0 : i32
    return %c0_i32, %c0_i32_0 : i32, i32
  }
  func.func @transform_3(%arg0: i32) -> (i32, i32) {
    %c0_i32 = arith.constant 0 : i32
    %c0_i32_0 = arith.constant 0 : i32
    %c0_i32_1 = arith.constant 0 : i32
    return %c0_i32, %c0_i32_0 : i32, i32
  }
  func.func @transform_4(%arg0: i32) -> (i32, i32) {
    %c0_i32 = arith.constant 0 : i32
    %c0_i32_0 = arith.constant 0 : i32
    %c0_i32_1 = arith.constant 0 : i32
    return %c0_i32, %c0_i32_0 : i32, i32
  }
  func.func @transform_5(%arg0: i32) -> (i32, i32) {
    %c0_i32 = arith.constant 0 : i32
    %c0_i32_0 = arith.constant 0 : i32
    return %arg0, %c0_i32 : i32, i32
  }
}

</mosaic_0001>

<bundles_post_ra>
// kernel: tpu_custom_call.1
= control target key start
LH: loop header
LB: loop body
LE: loop exit
PB: predicated region body
PF: predicated region fallthrough
CT: control target
= control target key end

     0   :  { %10 = vsyncpa [#allocation3], 0  ;;  %s837_s0 = inlined_call_operand.vmem [shape: f32[16,32], index: 0, kind: input, shape index: {}]   ;;  %s838_s1 = inlined_call_operand.vmem [shape: f32[32,64], index: 1, kind: input, shape index: {}]   ;;  %s839_s2 = inlined_call_operand.vmem [shape: f32[1,64], index: 2, kind: input, shape index: {}]   ;;  %s840_s3 = inlined_call_operand.vmem [shape: f32[64,32], index: 3, kind: input, shape index: {}]   ;;  %s841_s4 = inlined_call_operand.vmem [shape: f32[1,32], index: 4, kind: input, shape index: {}]   ;;  %s842_s5 = inlined_call_operand.hbm [shape: f32[16,32], index: 5, kind: output, shape index: {}]  }
   0x1   :  { %12 = vsyncpa [#allocation3 + $0x1], 0  ;;  %s693_s18 = smov 0   ;;  %s695_s19 = smov 0  }
   0x2   :  { %s697_s20 = smov 0   ;;  %s699_s21 = smov 0  }
   0x3 LB: > { %s714_s22 = sadd.s32 4294967295, %s657_s21   ;;  %s475_s23 = sadd.s32 4294967294, %s657_s21   ;;  %s657_s21 = sphi %s699_s21, %s848_s21   ;;  %s653_s20 = sphi %s697_s20, %s847_s20   ;;  %s649_s19 = sphi %s695_s19, %s846_s19   ;;  %s645_s18 = sphi %s693_s18, %s845_s18  }
   0x4   : > { %s718_s24 = sadd.s32 1, %s657_s21   ;;  %s135_s25 = sadd.s32 1, %s653_s20 }
   0x5   : > { %s132_s26 = ssub.s32 %s657_s21, %s718_s24  ;;  %p145_p0 = scmp.ne.s32.totalorder %s653_s20, %s649_s19 }
   0x6   : > { %p133_p1 = scmp.eq.s32.totalorder %s132_s26, 0  ;;  %p146_p2 = scmp.eq.s32.totalorder %s714_s22, 1 }
   0x7   : > { %p151_p3 = scmp.ne.s32.totalorder %s649_s19, %s645_s18  ;;  %p152_p4 = scmp.eq.s32.totalorder %s475_s23, 1 }
   0x8   : > { %s729_s27 = scalar_select %p133_p1, %s653_s20, %s135_s25  }
   0x9   : > { %p731_p5 = por %p146_p2, %p145_p0  ;;  %p735_p6 = por %p152_p4, %p151_p3 }
   0xa   : > { %p478_p7 = scmp.ge.s32.totalorder %s657_s21, 1  ;;  %p189_p8 = scmp.lt.s32.totalorder %s657_s21, 3 }
   0xc   : > { %p190_p9 = pnand %p478_p7, %p189_p8 }
   0xd   : > { %v221_v0 = vld [vmem:[%s838_s1] sm:$0xff] (!%p190_p9)  ;;  %v222_v1 = vld [vmem:[%s838_s1 + $0x8] sm:$0xff] (!%p190_p9)  ;;  %v223_v2 = vld [vmem:[%s838_s1 + $0x10] sm:$0xff] (!%p190_p9)  ;;  %v659_v3 = vmov (!%p190_p9), 0.0|0.0   ;;  %vm660_vm0 = vmmov (!%p190_p9), 0   ;;  %v661_v6 = vmov (!%p190_p9), 0.0  }
   0xe   : > { %193 = sbr.rel (%p190_p9) target bundleno = 487 (0x1e7), region = 40  ;;  %533 = vmatprep.subr.bf16.mxu0 (!%p190_p9), %v659_v3  ;;  %v534_v4 = vpack.c.bf16 (!%p190_p9), %v222_v1, %v221_v0  ;;  %v224_v5 = vld [vmem:[%s838_s1 + $0x18] sm:$0xff] (!%p190_p9)  ;;  %511 = vmatprep.mubr.msk.f32.mxu0 (!%p190_p9), %vm660_vm0, %v661_v6  ;;  %p216_p10 = scmp.lt.s32.totalorder (!%p190_p9), %s714_s22, 1  ;;  %vm232_vm1 = vcmask (!%p190_p9), 261120   ;;  %v311_v9 = vld [vmem:[%s840_s3] sm:$0xff] (!%p190_p9)  ;;  %v312_v10 = vld [vmem:[%s840_s3 + $0x8] sm:$0xff] (!%p190_p9) }
   0xf   : > { %539 = vmatprep.subr.bf16.mxu1 (!%p190_p9), %v659_v3  ;;  %530 = vmatprep.mubr.msk.f32.mxu1 (!%p190_p9), %vm660_vm0, %v661_v6  ;;  %v537_v7 = vpack.c.bf16 (!%p190_p9), %v224_v5, %v223_v2  ;;  %v540_v11 = vpack.c.bf16 (!%p190_p9), %v312_v10, %v311_v9  ;;  %v313_v12 = vld [vmem:[%s840_s3 + $0x10] sm:$0xff] (!%p190_p9)  ;;  %v314_v13 = vld [vmem:[%s840_s3 + $0x18] sm:$0xff] (!%p190_p9)  ;;  %v315_v15 = vld [vmem:[%s840_s3 + $0x20] sm:$0xff] (!%p190_p9)  ;;  %vm326_vm2 = vcmask (!%p190_p9), 523264   ;;  %s213_s26 = sand.u32 (!%p190_p9), 1, %s649_s19   ;;  %s486_s8 = sshll.u32 (!%p190_p9), %s714_s22, 7 }
  0x10   : > { %535 = vmatpush3.bf16.msra.mxu0 (!%p190_p9), %v534_v4  ;;  %v543_v14 = vpack.c.bf16 (!%p190_p9), %v314_v13, %v313_v12  ;;  %v316_v16 = vld [vmem:[%s840_s3 + $0x28] sm:$0xff] (!%p190_p9)  ;;  %v317_v18 = vld [vmem:[%s840_s3 + $0x30] sm:$0xff] (!%p190_p9)  ;;  %v318_v19 = vld [vmem:[%s840_s3 + $0x38] sm:$0xff] (!%p190_p9)  ;;  %s479_s30 = sshll.u32 (!%p190_p9), %s213_s26, 3 }
  0x11   : > { %536 = vmatprep.subr.bf16.mxu0 (!%p190_p9), %v659_v3  ;;  %541 = vmatpush3.bf16.msra.mxu1 (!%p190_p9), %v540_v11  ;;  %v546_v17 = vpack.c.bf16 (!%p190_p9), %v316_v16, %v315_v15  ;;  %v549_v20 = vpack.c.bf16 (!%p190_p9), %v318_v19, %v317_v18  ;;  %v481_v21 = vld [vmem:[%s839_s2] ss:$0 sm:$0xff] (!%p190_p9)  ;;  %s215_s9 = scalar_lea.vmem (!%p190_p9), [#allocation2], %s479_s30 }
  0x12   : > { %542 = vmatprep.subr.bf16.mxu1 (!%p190_p9), %v659_v3  ;;  %v483_v30 = vld [vmem:[%s841_s4] ss:$0 sm:$0xff] (!%p190_p9)  ;;  %s416_s10 = sshll.u32 (!%p190_p9), %s215_s9, 4  ;;  %s796_s10 = int_to_ptr.vmem [resolvable:$true] %s416_s10 }
  0x13   : > { %s595_s15 = scalar_lea.vmem (!%p190_p9), %s796_s10, 128 }
  0x14   : > { %538 = vmatpush3.bf16.msra.mxu0 (!%p190_p9), %v537_v7  ;;  %p596_p11 = scmp.ne.s32.totalorder (!%p190_p9), %s796_s10, %s595_s15 }
  0x15   : > { %s217_s13 = scalar_select %p216_p10, %s714_s22, 1  ;;  %544 = vmatpush3.bf16.msra.mxu1 %v543_v14 }
  0x16   : > { %545 = vmatprep.subr.bf16.mxu1 %v659_v3  ;;  %p597_p12 = pnand %p596_p11, %p731_p5  ;;  %s662_s22 = smov [#allocation2]  }
  0x17   : > { %s480_s14 = sshll.u32 %s217_s13, 3  ;;  %s794_s13 = scalar_lea.hbm %s842_s5, %s486_s8 }
  0x18   : > { %s219_s17 = scalar_lea.vmem %s837_s0, %s480_s14  ;;  %s403_s14 = scalar_lea.sflag [#allocation3], %s213_s26 }
  0x19   : > { %v220_v8 = vld [vmem:[%s219_s17] sm:$0xff]  ;;  %547 = vmatpush3.bf16.msra.mxu1 %v546_v17  ;;  %p598_p13 = pneg %p597_p12  ;;  %s599_s16 = sshll.u32 %s662_s22, 4  ;;  %s600_s16 = int_to_ptr.vmem [resolvable:$false] %s599_s16 }
  0x1a   : > { %512 = vmatmul.mubr.msk.f32.vlgmr.msra.gmra.mrb[0].mxu0 %vm232_vm1, %v220_v8  ;;  %548 = vmatprep.subr.bf16.mxu1 %v659_v3  ;;  %s601_s17 = scalar_lea.vmem %s600_s16, 256  ;;  %p602_p0 = scmp.lt.s32.totalorder %s796_s10, %s600_s16 }
  0x1b   : > { %p603_p1 = scmp.lt.s32.totalorder %s601_s17, %s595_s15 }
  0x1d   : > { %550 = vmatpush3.bf16.msra.mxu1 %v549_v20  ;;  %p604_p2 = por %p603_p1, %p602_p0 }
  0x1f   : > { %p605_p3 = pnand %p604_p2, %p598_p13 }
  0xed   : > { %v302_v22 = vpop.f32.mrb[0].mxu0 }
  0xee   : > { %v303_v23 = vadd.f32 %v481_v21, %v302_v22  ;;  %v513_v24 = vpop.f32.mrb[1].mxu0 }
  0xf0   : > { %v307_v25 = vmul.f32 0.70710677, %v303_v23  ;;  %v306_v27 = vmul.f32 0.5, %v303_v23 }
  0xf2   : > { %593 = verf.f32 %v307_v25 }
  0xfc   : > { %v594_v26 = vpop.eup %593 }
  0xfd   : > { %v309_v28 = vadd.f32 1.0, %v594_v26 }
  0xff   : > { %v310_v29 = vmul.f32 %v309_v28, %v306_v27 }
 0x101   : > { %531 = vmatmul.mubr.msk.f32.vlgmr.msra.gmra.mrb[0].mxu1 %vm326_vm2, %v310_v29 }
 0x1d4   : > { %v396_v31 = vpop.f32.mrb[0].mxu1 }
 0x1d5   : > { %v397_v32 = vadd.f32 %v483_v30, %v396_v31  ;;  %v532_v33 = vpop.f32.mrb[1].mxu1 }
 0x1d7   : > { %v400_v34 = vadd.f32 %v397_v32, %v220_v8 }
 0x1d9   : > { %401 = vst.msk [vmem:[%s215_s9] sm:$0xff] %vm232_vm1, %v400_v34 }
 0x1da   : > { %608 = shalt.err (!%p605_p3)
}
 0x1db   : > { %s609_s23 = scalar_lea.hbm %s794_s13, 128  ;;  %s613_s30 = scalar_lea.hbm %s842_s5, 256 }
 0x1dc   : > { %p610_p4 = scmp.ne.s32.totalorder %s794_s13, %s609_s23  ;;  %p614_p9 = scmp.lt.u32.totalorder %s794_s13, %s842_s5 }
 0x1dd   : > { %p615_p10 = scmp.lt.u32.totalorder %s613_s30, %s609_s23  ;;  %p617_p12 = scmp.lt.u32.totalorder %s609_s23, %s794_s13 }
 0x1de   : > { %p611_p7 = pnand %p610_p4, %p731_p5 }
 0x1df   : > { %p616_p11 = por %p615_p10, %p614_p9 }
 0x1e0   : > { %p612_p8 = pneg %p611_p7 }
 0x1e1   : > { %p618_p13 = por %p617_p12, %p616_p11 }
 0x1e3   : > { %p619_p0 = pnand %p618_p13, %p612_p8 }
 0x1e5   : > { %622 = shalt.err (!%p619_p0)
}
 0x1e6   : > { %551 = dma.vmem_to_hbm [thread:$0]  (%p731_p5), %s796_s10, 128, %s794_s13, %s403_s14  }
 0x1e7 PF: > { %p557_p1 = scmp.ge.s32.totalorder %s657_s21, 2  ;;  %s428_s8 = sand.u32 1, %s645_s18  }
 0x1e8   : > { %s429_s9 = scalar_lea.sflag [#allocation3], %s428_s8 }
 0x1e9   : > { %p554_p2 = pnand %p557_p1, %p735_p6 }
 0x1eb   : > { %640 = dma.done.wait (!%p554_p2), %s429_s9, 128  }
 0x1ec   : > { %642 = vsyncadd (!%p554_p2), %s429_s9, 4294967168  ;;  %p15_p3 = scmp.ge.s32.totalorder %s718_s24, 4   ;;  %s845_s18 = smov %s649_s19 }
 0x1ed   : > { %s846_s19 = smov %s653_s20  ;;  %s847_s20 = smov %s729_s27 }
 0x1ee   : > { %s848_s21 = smov %s718_s24  ;;  %17 = sbr.rel (!%p15_p3) target bundleno = 3 (0x3), region = 75 }
 0x1f5   :  { %434 = vsyncpa [#allocation3], 1 }
 0x1f6   :  { %436 = vsyncpa [#allocation3 + $0x1], 1 }

</bundles_post_ra>
